<compile_context>
chip_gen: v7x
topology: tpu7x:2x2x1
jax: 0.10.0
libtpu: 0.0.40
codegen_flags: <defaults>
</compile_context>

<pallas_src>
import functools

import jax
import jax.numpy as jnp
from jax import lax
from jax.experimental import pallas as pl
from jax.experimental.pallas import tpu as pltpu


def _round_up(a, b):
    return ((a + b - 1) // b) * b


def _hswish(x):
    # HSwish: x * relu6(x + 3) / 6
    return x * jnp.clip(x + 3.0, 0.0, 6.0) * (1.0 / 6.0)


# ----------------------------------------------------------------------------
# Primary path: one whole sample per grid step (no S tiling, no scratch).
# ----------------------------------------------------------------------------
def _context_pool_full_kernel(x_ref, w_ref, b_ref, o_ref):
    # x_ref : (1, C, S)  one full sample (input dtype)
    # w_ref : (C, 1)     BN-folded 1x1x1 conv weight (f32), VMEM-resident
    # b_ref : (1,)       BN-folded bias (f32), SMEM scalar
    # o_ref : (1, C, 1)  context output for this sample
    x = x_ref[0].astype(jnp.float32)                               # (C, S)
    w = w_ref[...]                                                 # (C, 1)

    # encoder (C->1 conv, BN folded) + HSwish — VPU multiply + sublane reduce, f32.
    keys = _hswish(jnp.sum(x * w, axis=0, keepdims=True) + b_ref[0])   # (1, S)

    # softmax over S, fused with the context reduction (lane-axis reduce).
    m = jnp.max(keys, axis=-1, keepdims=True)                      # (1, 1)
    p = jnp.exp(keys - m)                                          # (1, S)
    denom = jnp.sum(p, axis=-1, keepdims=True)                     # (1, 1)
    ctx = jnp.sum(x * p, axis=-1, keepdims=True) / denom           # (C, 1)

    o_ref[...] = ctx.reshape(o_ref.shape).astype(o_ref.dtype)


# ----------------------------------------------------------------------------
# Fallback path: stream S in lane-aligned tiles with an online softmax.
# ----------------------------------------------------------------------------
def _context_pool_tiled_kernel(x_ref, w_ref, b_ref, o_ref, m_sc, l_sc, acc_sc,
                               *, s_true, s_tile):
    # x_ref : (1, C, S_TILE)   current spatial tile (input dtype)
    # w_ref : (C, 1)           folded weight (f32), VMEM-resident
    # b_ref : (1,)             folded bias (f32), SMEM
    # o_ref : (1, C, 1)        context output for this sample
    # m_sc/l_sc : (1, 1) f32   running softmax max / denominator
    # acc_sc    : (C, 1) f32   running (unnormalised) context accumulator
    s_idx = pl.program_id(1)
    num_s = pl.num_programs(1)

    @pl.when(s_idx == 0)
    def _init():
        m_sc[...] = jnp.full_like(m_sc, -1e30)
        l_sc[...] = jnp.zeros_like(l_sc)
        acc_sc[...] = jnp.zeros_like(acc_sc)

    x = x_ref[0].astype(jnp.float32)                               # (C, S_TILE)
    w = w_ref[...]                                                 # (C, 1)

    has_tail = (s_true % s_tile) != 0
    if has_tail:
        # No wrapper-side pad: the last block's VMEM tail is stale/undefined, so zero those
        # x columns (protects the context sum from NaN/Inf garbage) and later mask keys.
        # The mask is all-True on interior tiles; its VPU cost is fully hidden under the
        # per-tile DMA (bandwidth-bound kernel), so it is computed branchlessly.
        pos = s_idx * s_tile + lax.broadcasted_iota(jnp.int32, (1, s_tile), 1)
        valid = pos < s_true                                        # (1, S_TILE)
        x = jnp.where(valid, x, 0.0)

    keys = _hswish(jnp.sum(x * w, axis=0, keepdims=True) + b_ref[0])    # (1, S_TILE)
    if has_tail:
        keys = jnp.where(valid, keys, -1e30)

    # Online softmax over the spatial axis, fused with the context reduction (all f32).
    m_prev = m_sc[...]                                              # (1, 1)
    m_new = jnp.maximum(m_prev, jnp.max(keys, axis=-1, keepdims=True))
    alpha = jnp.exp(m_prev - m_new)                                 # (1, 1)
    p = jnp.exp(keys - m_new)                                       # (1, S_TILE)

    l_sc[...] = alpha * l_sc[...] + jnp.sum(p, axis=-1, keepdims=True)
    acc_sc[...] = alpha * acc_sc[...] + jnp.sum(x * p, axis=-1, keepdims=True)   # (C, 1)
    m_sc[...] = m_new

    @pl.when(s_idx == num_s - 1)
    def _finalize():
        ctx = acc_sc[...] / l_sc[...]                               # (C, 1)
        o_ref[...] = ctx.reshape(o_ref.shape).astype(o_ref.dtype)


# ----------------------------------------------------------------------------
# Wrapper
# ----------------------------------------------------------------------------
def context_pool_3d(x, conv_w, bn_gamma, bn_beta, bn_mean, bn_var,
                    *, bn_eps=1e-5, force_s_tile=None):
    """x: (N, C, T, H, W); conv_w: (1, C, 1, 1, 1); BN params: (1,) each."""
    n, c, t, h, w_ = x.shape
    s = t * h * w_
    itemsize = jnp.dtype(x.dtype).itemsize

    # Fold BatchNorm3d (inference) into the (C -> 1) conv: keys = sum_c x[c]*w_eff[c] + b_eff.
    scale = (bn_gamma / jnp.sqrt(bn_var + bn_eps)).astype(jnp.float32)          # (1,)
    w_eff = (conv_w.reshape(c, 1).astype(jnp.float32) * scale.reshape(1, 1))    # (C, 1)
    b_eff = (bn_beta - bn_mean * scale).astype(jnp.float32)                     # (1,)

    x_flat = x.reshape(n, c, s)          # pure view — no extra HBM pass

    # Per-generation VMEM budgeting (v7x: 64 MiB physical per TC; v5e/v6e: 128 MiB).
    try:
        phys_vmem = getattr(pltpu.get_tpu_info(), "vmem_capacity_bytes", 64 * 2**20)
    except Exception:
        phys_vmem = 64 * 2**20                      # v7x-safe fallback
    vmem_limit = int(min(phys_vmem * 3 // 4, 96 * 2**20))
    work_budget = vmem_limit // 2                    # headroom for compiler scratch / spills

    # Rough bytes of VMEM live per spatial position: 2 pipeline buffers of the input block,
    # the loaded tile, and ~2 f32 (C, tile)-shaped elementwise intermediates.
    per_s_bytes = c * (3 * itemsize + 3 * 4)

    use_full_s = force_s_tile is None and per_s_bytes * s <= work_budget

    cost = pl.CostEstimate(
        flops=4 * n * c * s,                         # keys reduce + context reduce
        transcendentals=2 * n * s,                   # softmax exps
        bytes_accessed=n * c * s * itemsize + n * c * itemsize + c * 4 + 4,
    )

    if use_full_s:
        out = pl.pallas_call(
            _context_pool_full_kernel,
            out_shape=jax.ShapeDtypeStruct((n, c, 1), x.dtype),
            grid_spec=pltpu.PrefetchScalarGridSpec(
                num_scalar_prefetch=0,
                grid=(n,),
                in_specs=[
                    pl.BlockSpec((1, c, s), lambda i: (i, 0, 0)),
                    pl.BlockSpec((c, 1), lambda i: (0, 0)),            # VMEM-resident weight
                    pl.BlockSpec(memory_space=pltpu.MemorySpace.SMEM),  # scalar bias
                ],
                out_specs=pl.BlockSpec((1, c, 1), lambda i: (i, 0, 0)),
            ),
            compiler_params=pltpu.CompilerParams(
                dimension_semantics=("parallel",),
                vmem_limit_bytes=vmem_limit,
            ),
            cost_estimate=cost,
        )(x_flat, w_eff, b_eff)
    else:
        if force_s_tile is not None:
            s_tile = int(force_s_tile)
        else:
            s_tile = 2048                             # lane-aligned; shrink to fit budget
            while s_tile > 128 and per_s_bytes * s_tile > work_budget:
                s_tile //= 2
            s_tile = min(s_tile, _round_up(s, 128))
        num_s_tiles = pl.cdiv(s, s_tile)              # ragged tail handled in-kernel (no pad)

        kernel = functools.partial(_context_pool_tiled_kernel, s_true=s, s_tile=s_tile)
        out = pl.pallas_call(
            kernel,
            out_shape=jax.ShapeDtypeStruct((n, c, 1), x.dtype),
            grid_spec=pltpu.PrefetchScalarGridSpec(
                num_scalar_prefetch=0,
                grid=(n, num_s_tiles),
                in_specs=[
                    pl.BlockSpec((1, c, s_tile), lambda i, j: (i, 0, j)),
                    pl.BlockSpec((c, 1), lambda i, j: (0, 0)),          # VMEM-resident weight
                    pl.BlockSpec(memory_space=pltpu.MemorySpace.SMEM),  # scalar bias
                ],
                out_specs=pl.BlockSpec((1, c, 1), lambda i, j: (i, 0, 0)),
                scratch_shapes=[
                    pltpu.VMEM((1, 1), jnp.float32),   # running max
                    pltpu.VMEM((1, 1), jnp.float32),   # running denominator
                    pltpu.VMEM((c, 1), jnp.float32),   # context accumulator
                ],
            ),
            compiler_params=pltpu.CompilerParams(
                dimension_semantics=("parallel", "arbitrary"),
                vmem_limit_bytes=vmem_limit,
            ),
            cost_estimate=cost,
        )(x_flat, w_eff, b_eff)

    # Match PyTorch output shape (N, C, 1, 1, 1).
    return out.reshape(n, c, 1, 1, 1)


# ----------------------------------------------------------------------------
# Self-test
# ----------------------------------------------------------------------------
def _reference(x, conv_w, bn_gamma, bn_beta, bn_mean, bn_var, bn_eps):
    n, c = x.shape[0], x.shape[1]
    s = x.shape[2] * x.shape[3] * x.shape[4]
    scale = bn_gamma / jnp.sqrt(bn_var + bn_eps)
    w_fold = conv_w.reshape(c) * scale
    b_fold = bn_beta - bn_mean * scale
    x_flat = x.reshape(n, c, s)
    keys = jnp.einsum('ncs,c->ns', x_flat, w_fold,
                      precision=lax.Precision.HIGHEST) + b_fold
    keys = _hswish(keys)
    attn = jax.nn.softmax(keys, axis=-1)
    return jnp.einsum('ncs,ns->nc', x_flat, attn,
                      precision=lax.Precision.HIGHEST).reshape(n, c, 1, 1, 1)


if __name__ == "__main__":
    EPS = 1e-5
    key = jax.random.PRNGKey(0)
    kx, kw, kg, kb, km, kv, kx2 = jax.random.split(key, 7)

    # Small shapes consistent with the module: in_channels=4, batch=2.
    N, C, T, H, W = 2, 4, 4, 8, 8
    x = jax.random.normal(kx, (N, C, T, H, W), dtype=jnp.float32)
    conv_w = jax.random.normal(kw, (1, C, 1, 1, 1), dtype=jnp.float32) * (1.0 / jnp.sqrt(C))
    bn_gamma = 1.0 + 0.1 * jax.random.normal(kg, (1,), dtype=jnp.float32)
    bn_beta = 0.1 * jax.random.normal(kb, (1,), dtype=jnp.float32)
    bn_mean = 0.1 * jax.random.normal(km, (1,), dtype=jnp.float32)
    bn_var = jax.random.uniform(kv, (1,), dtype=jnp.float32, minval=0.5, maxval=1.5)

    # Primary (full-S) path.
    out = context_pool_3d(x, conv_w, bn_gamma, bn_beta, bn_mean, bn_var, bn_eps=EPS)
    jax.block_until_ready(out)
    assert out.shape == (N, C, 1, 1, 1), out.shape
    ref = _reference(x, conv_w, bn_gamma, bn_beta, bn_mean, bn_var, EPS)
    err = float(jnp.max(jnp.abs(out - ref)))
    assert jnp.allclose(out, ref, atol=1e-4, rtol=1e-4), err

    # Streamed fallback path with a ragged last tile (S = 3*7*7 = 147, s_tile = 128).
    T2, H2, W2 = 3, 7, 7
    x2 = jax.random.normal(kx2, (N, C, T2, H2, W2), dtype=jnp.float32)
    out2 = context_pool_3d(x2, conv_w, bn_gamma, bn_beta, bn_mean, bn_var,
                           bn_eps=EPS, force_s_tile=128)
    jax.block_until_ready(out2)
    ref2 = _reference(x2, conv_w, bn_gamma, bn_beta, bn_mean, bn_var, EPS)
    err2 = float(jnp.max(jnp.abs(out2 - ref2)))
    assert jnp.allclose(out2, ref2, atol=1e-4, rtol=1e-4), err2

    print("KERNEL_OK")
</pallas_src>

<mosaic_0001>
module attributes {stable_mosaic.version = 11 : i64} {
  func.func @_context_pool_full_kernel(%arg0: i32, %arg1: memref<1x4x256xf32, #tpu.memory_space<vmem>>, %arg2: memref<4x1xf32, #tpu.memory_space<vmem>>, %arg3: memref<1xf32, #tpu.memory_space<smem>>, %arg4: memref<1x4x1xf32, #tpu.memory_space<vmem>>) attributes {dimension_semantics = [#tpu.dimension_semantics<parallel>], iteration_bounds = array<i64: 2>, scalar_prefetch = 0 : i64, scratch_operands = 0 : i64, tpu.core_type = #tpu.core_type<tc>, window_params = [{transform_indices = @transform_0, window_bounds = array<i64: 1, 4, 256>}, {pipeline_mode = #tpu.pipeline_mode<synchronous>, transform_indices = @transform_1, window_bounds = array<i64: 4, 1>}, {transform_indices = @transform_2, window_bounds = array<i64: 1>}, {transform_indices = @transform_3, window_bounds = array<i64: 1, 4, 1>}]} {
    %c0 = arith.constant 0 : index
    %c0_0 = arith.constant 0 : index
    %c0_1 = arith.constant 0 : index
    %0 = vector.load %arg1[%c0, %c0_0, %c0_1] : memref<1x4x256xf32, #tpu.memory_space<vmem>>, vector<1x4x256xf32>
    %1 = vector.shape_cast %0 : vector<1x4x256xf32> to vector<4x256xf32>
    %c0_2 = arith.constant 0 : index
    %c0_3 = arith.constant 0 : index
    %2 = vector.load %arg2[%c0_2, %c0_3] : memref<4x1xf32, #tpu.memory_space<vmem>>, vector<4x1xf32>
    %3 = vector.broadcast %2 : vector<4x1xf32> to vector<4x256xf32>
    %4 = arith.mulf %1, %3 : vector<4x256xf32>
    %cst = arith.constant dense<0.000000e+00> : vector<256xf32>
    %5 = vector.multi_reduction <add>, %4, %cst [0] : vector<4x256xf32> to vector<256xf32>
    %6 = vector.shape_cast %5 : vector<256xf32> to vector<1x256xf32>
    %c0_4 = arith.constant 0 : index
    %7 = memref.load %arg3[%c0_4] : memref<1xf32, #tpu.memory_space<smem>>
    %8 = vector.broadcast %7 : f32 to vector<1x256xf32>
    %9 = arith.addf %6, %8 : vector<1x256xf32>
    %cst_5 = arith.constant 3.000000e+00 : f32
    %10 = vector.broadcast %cst_5 : f32 to vector<1x256xf32>
    %11 = arith.addf %9, %10 : vector<1x256xf32>
    %cst_6 = arith.constant 0.000000e+00 : f32
    %cst_7 = arith.constant 6.000000e+00 : f32
    %12 = vector.broadcast %cst_6 : f32 to vector<1x256xf32>
    %13 = arith.maximumf %12, %11 : vector<1x256xf32>
    %14 = vector.broadcast %cst_7 : f32 to vector<1x256xf32>
    %15 = arith.minimumf %14, %13 : vector<1x256xf32>
    %16 = arith.mulf %9, %15 : vector<1x256xf32>
    %cst_8 = arith.constant 0.166666672 : f32
    %17 = vector.broadcast %cst_8 : f32 to vector<1x256xf32>
    %18 = arith.mulf %16, %17 : vector<1x256xf32>
    %cst_9 = arith.constant dense<0xFF800000> : vector<1xf32>
    %19 = vector.multi_reduction <maximumf>, %18, %cst_9 [1] : vector<1x256xf32> to vector<1xf32>
    %20 = vector.shape_cast %19 : vector<1xf32> to vector<1x1xf32>
    %21 = vector.broadcast %20 : vector<1x1xf32> to vector<1x256xf32>
    %22 = arith.subf %18, %21 : vector<1x256xf32>
    %23 = math.exp %22 : vector<1x256xf32>
    %cst_10 = arith.constant dense<0.000000e+00> : vector<1xf32>
    %24 = vector.multi_reduction <add>, %23, %cst_10 [1] : vector<1x256xf32> to vector<1xf32>
    %25 = vector.shape_cast %24 : vector<1xf32> to vector<1x1xf32>
    %26 = vector.broadcast %23 : vector<1x256xf32> to vector<4x256xf32>
    %27 = arith.mulf %1, %26 : vector<4x256xf32>
    %cst_11 = arith.constant dense<0.000000e+00> : vector<4xf32>
    %28 = vector.multi_reduction <add>, %27, %cst_11 [1] : vector<4x256xf32> to vector<4xf32>
    %29 = vector.shape_cast %28 : vector<4xf32> to vector<4x1xf32>
    %30 = vector.broadcast %25 : vector<1x1xf32> to vector<4x1xf32>
    %31 = arith.divf %29, %30 : vector<4x1xf32>
    %32 = vector.shape_cast %31 : vector<4x1xf32> to vector<1x4x1xf32>
    %c0_12 = arith.constant 0 : index
    %c0_13 = arith.constant 0 : index
    %c0_14 = arith.constant 0 : index
    %33 = vector.load %arg4[%c0_12, %c0_13, %c0_14] : memref<1x4x1xf32, #tpu.memory_space<vmem>>, vector<1x4x1xf32>
    tpu.vector_store %arg4[%c0_12, %c0_13, %c0_14], %32 {strides = array<i32>} : memref<1x4x1xf32, #tpu.memory_space<vmem>>, vector<1x4x1xf32>,
    return
  }
  func.func @transform_0(%arg0: i32) -> (i32, i32, i32) {
    %c0_i32 = arith.constant 0 : i32
    %c0_i32_0 = arith.constant 0 : i32
    %c0_i32_1 = arith.constant 0 : i32
    return %arg0, %c0_i32, %c0_i32_0 : i32, i32, i32
  }
  func.func @transform_1(%arg0: i32) -> (i32, i32) {
    %c0_i32 = arith.constant 0 : i32
    %c0_i32_0 = arith.constant 0 : i32
    %c0_i32_1 = arith.constant 0 : i32
    return %c0_i32, %c0_i32_0 : i32, i32
  }
  func.func @transform_2(%arg0: i32) -> i32 {
    %c0_i32 = arith.constant 0 : i32
    %c0_i32_0 = arith.constant 0 : i32
    return %c0_i32 : i32
  }
  func.func @transform_3(%arg0: i32) -> (i32, i32, i32) {
    %c0_i32 = arith.constant 0 : i32
    %c0_i32_0 = arith.constant 0 : i32
    %c0_i32_1 = arith.constant 0 : i32
    return %arg0, %c0_i32, %c0_i32_0 : i32, i32, i32
  }
}

</mosaic_0001>

<bundles_post_ra>
// kernel: tpu_custom_call.1
= control target key start
LH: loop header
LB: loop body
LE: loop exit
PB: predicated region body
PF: predicated region fallthrough
CT: control target
= control target key end

     0   :  { %s595_s0 = inlined_call_operand.hbm [shape: f32[2,4,256], index: 0, kind: input, shape index: {}]   ;;  %s596_s1 = inlined_call_operand.vmem [shape: f32[4,1], index: 1, kind: input, shape index: {}]   ;;  %s597_s2 = inlined_call_operand.<no memory space> [shape: f32[1], index: 2, kind: input, shape index: {}]   ;;  %s598_s3 = inlined_call_operand.vmem [shape: f32[2,4,1], index: 3, kind: output, shape index: {}]  }
   0x1   :  { %8 = sst [smem:[#allocation2]] %s597_s2 }
   0x2   :  { %9 = vsyncpa [#allocation4], 0 }
   0x3   :  { %11 = vsyncpa [#allocation4 + $0x1], 0  ;;  %s481_s14 = smov 0   ;;  %s483_s15 = smov 0  }
   0x4   :  { %s485_s16 = smov 0   ;;  %s487_s17 = smov 0  }
   0x5 LB: > { %s500_s2 = sadd.s32 4294967295, %s453_s17   ;;  %s503_s18 = sadd.s32 1, %s453_s17   ;;  %s453_s17 = sphi %s487_s17, %s606_s17   ;;  %s449_s16 = sphi %s485_s16, %s605_s16   ;;  %s445_s15 = sphi %s483_s15, %s604_s15   ;;  %s441_s14 = sphi %s481_s14, %s603_s14  }
   0x6   : > { %s21_s19 = ssub.s32 %s453_s17, %s503_s18  ;;  %s24_s20 = sadd.s32 1, %s449_s16 }
   0x7   : > { %p22_p0 = scmp.eq.s32.totalorder %s21_s19, 0  ;;  %p31_p1 = scmp.ne.s32.totalorder %s449_s16, %s445_s15 }
   0x8   : > { %p32_p2 = scmp.eq.s32.totalorder %s453_s17, 0  ;;  %p37_p3 = scmp.ne.s32.totalorder %s445_s15, %s441_s14 }
   0x9   : > { %s513_s21 = scalar_select %p22_p0, %s449_s16, %s24_s20  }
   0xa   : > { %p33_p4 = por %p32_p2, %p31_p1  ;;  %p38_p5 = scmp.eq.s32.totalorder %s500_s2, 0 }
   0xb   : > { %p347_p6 = scmp.lt.s32.totalorder %s453_s17, 2  ;;  %s135_s23 = sand.u32 1, %s449_s16  }
   0xc   : > { %p517_p7 = por %p38_p5, %p37_p3  ;;  %s332_s24 = sshll.u32 %s135_s23, 3 }
   0xd   : > { %s340_s25 = sshll.u32 %s453_s17, 7  ;;  %s139_s29 = scalar_lea.vmem [#allocation3], %s332_s24 }
   0xe   : > { %s526_s28 = scalar_lea.hbm %s595_s0, %s340_s25  ;;  %s147_s30 = sshll.u32 %s139_s29, 4  ;;  %s528_s30 = int_to_ptr.vmem [resolvable:$true] %s147_s30 }
   0xf   : > { %p530_p8 = pnand %p347_p6, %p33_p4  ;;  %s136_s5 = scalar_lea.sflag [#allocation4], %s135_s23 }
  0x10   : > { %s389_s6 = scalar_lea.hbm %s526_s28, 128  ;;  %s394_s9 = scalar_lea.hbm %s595_s0, 256 }
  0x11   : > { %p390_p11 = scmp.ne.s32.totalorder %s526_s28, %s389_s6  ;;  %p391_p12 = pneg %p530_p8 }
  0x12   : > { %p395_p1 = scmp.lt.u32.totalorder %s526_s28, %s595_s0  ;;  %p396_p2 = scmp.lt.u32.totalorder %s394_s9, %s389_s6 }
  0x13   : > { %p392_p13 = pnand %p391_p12, %p390_p11  ;;  %p398_p4 = scmp.lt.u32.totalorder %s389_s6, %s526_s28 }
  0x14   : > { %p397_p3 = por %p396_p2, %p395_p1 }
  0x15   : > { %p393_p0 = pneg %p392_p13 }
  0x16   : > { %p399_p5 = por %p398_p4, %p397_p3 }
  0x18   : > { %p400_p6 = pnand %p399_p5, %p393_p0 }
  0x1a   : > { %403 = shalt.err (!%p400_p6)
}
  0x1b   : > { %s404_s12 = scalar_lea.vmem %s528_s30, 128  ;;  %s455_s13 = smov [#allocation3]  }
  0x1c   : > { %p405_p11 = scmp.ne.s32.totalorder %s528_s30, %s404_s12  ;;  %s409_s14 = sshll.u32 %s455_s13, 4  ;;  %s410_s14 = int_to_ptr.vmem [resolvable:$false] %s409_s14 }
  0x1d   : > { %s411_s19 = scalar_lea.vmem %s410_s14, 256  ;;  %p412_p10 = scmp.lt.s32.totalorder %s528_s30, %s410_s14 }
  0x1e   : > { %p407_p13 = pnand %p405_p11, %p391_p12  ;;  %p413_p1 = scmp.lt.s32.totalorder %s411_s19, %s404_s12 }
  0x20   : > { %p408_p9 = pneg %p407_p13  ;;  %p414_p2 = por %p413_p1, %p412_p10 }
  0x22   : > { %p415_p3 = pnand %p414_p2, %p408_p9 }
  0x24   : > { %418 = shalt.err (!%p415_p3)
}
  0x25   : > { %346 = dma.hbm_to_vmem [thread:$0]  (!%p530_p8), %s526_s28, 128, %s528_s30, %s136_s5  }
  0x26   : > { %p601_p0 = scmp.lt.s32.totalorder %s453_s17, 3  ;;  %p602_p4 = scmp.ge.s32.totalorder %s453_s17, 1 }
  0x28   : > { %p153_p12 = pnand %p602_p4, %p601_p0 }
  0x29   : > { %s158_s20 = sand.u32 (!%p153_p12), 1, %s445_s15  }
  0x2a   : > { %156 = sbr.rel (%p153_p12) target bundleno = 529 (0x211), region = 32  ;;  %s336_s23 = sshll.u32 (!%p153_p12), %s158_s20, 3 }
  0x2b   : > { %s159_s24 = scalar_lea.sflag (!%p153_p12), [#allocation4], %s158_s20  ;;  %s162_s25 = scalar_lea.vmem (!%p153_p12), [#allocation3], %s336_s23 }
  0x31   : > { %436 = dma.done.wait (%p517_p7), %s159_s24, 128  }
  0x32   : > { %438 = vsyncadd (%p517_p7), %s159_s24, 4294967168  ;;  %v456_v0 = vmov 0   ;;  %v189_v1 = vld [vmem:[%s596_s1] sm:$0xf]  ;;  %v457_v2 = vmov 839922192   ;;  %v197_v4 = vlaneseq }
  0x33   : > { %382 = vset.pattern.permute.xlu0 %v456_v0  ;;  %v195_v3 = vunpack.c.l.s4 %v457_v2  ;;  %v188_v9 = vld [vmem:[%s162_s25] sm:$0xff]  ;;  %vm206_vm0 = vcmask 1043456   ;;  %s221_s17 = sld [smem:[#allocation2]]  ;;  %p184_p7 = scmp.lt.s32.totalorder %s500_s2, 1  ;;  %vm262_vm1 = vcmask 3072  }
  0x34   : > { %192 = vperm.xlu0 %382, %v189_v1   ;;  %v198_v6 = vshrl.u32 %v197_v4, 7 }
  0x35   : > { %v196_v5 = vunpack.c.0.s8 %v195_v3  ;;  %s608_s2 = smov (!%p184_p7, %s500_s2), 1 }
  0x36   : > { %s337_s22 = sshll.u32 %s608_s2, 2 }
  0x37   : > { %v199_v7 = vsub.s32 %v196_v5, %v198_v6  ;;  %s187_s30 = scalar_lea.vmem %s598_s3, %s337_s22 }
  0x39   : > { %v222_v24 = vstv %s221_s17 }
  0xb3   : > { %v193_v8 = vpop.permute.xlu0 %192 }
  0xb4   : > { %v200_v10 = vrot.slane %v193_v8, %v199_v7 }
  0xb6   : > { %v202_v11 = vmul.f32 %v200_v10, %v188_v9 }
  0xb8   : > { %v204_v12 = vcombine.high %v202_v11, %v202_v11  ;;  %v207_v13 = vsel %vm206_vm0, %v202_v11, 0.0 }
  0xb9   : > { %v208_v14 = vrot.slane %v207_v13, 4 }
  0xba   : > { %v214_v15 = vsel %vm206_vm0, %v204_v12, 0.0 }
  0xbb   : > { %v209_v16 = vadd.f32 %v208_v14, %v207_v13  ;;  %v215_v17 = vrot.slane %v214_v15, 4 }
  0xbd   : > { %v210_v18 = vrot.slane %v209_v16, 2  ;;  %v216_v19 = vadd.f32 %v215_v17, %v214_v15 }
  0xbf   : > { %v211_v20 = vadd.f32 %v210_v18, %v209_v16  ;;  %v217_v21 = vrot.slane %v216_v19, 2 }
  0xc1   : > { %v212_v22 = vrot.slane %v211_v20, 1  ;;  %v218_v23 = vadd.f32 %v217_v21, %v216_v19 }
  0xc3   : > { %v213_v25 = vadd.f32 %v212_v22, %v211_v20  ;;  %v219_v26 = vrot.slane %v218_v23, 1 }
  0xc5   : > { %v220_v27 = vadd.f32 %v219_v26, %v218_v23  ;;  %v223_v28 = vadd.f32 %v222_v24, %v213_v25 }
  0xc7   : > { %v224_v29 = vadd.f32 %v222_v24, %v220_v27  ;;  %v225_v30 = vadd.f32 3.0, %v223_v28 }
  0xc9   : > { %v226_v31 = vadd.f32 3.0, %v224_v29  ;;  %v227_v32 = vmax.f32 %v225_v30, 0.0 }
  0xcb   : > { %v228_v33 = vmax.f32 %v226_v31, 0.0  ;;  %v229_v34 = vmin.f32 %v227_v32, 6.0 }
  0xcd   : > { %v230_v35 = vmin.f32 %v228_v33, 6.0  ;;  %v231_v36 = vmul.f32 %v229_v34, %v223_v28 }
  0xcf   : > { %v232_v37 = vmul.f32 %v230_v35, %v224_v29  ;;  %v233_v38 = vmul.f32 0.16666667, %v231_v36 }
  0xd1   : > { %v234_v39 = vmul.f32 0.16666667, %v232_v37 }
  0xd3   : > { %v235_v40 = vmax.f32 %v233_v38, %v234_v39 }
  0xd5   : > { %236 = vmax.xlane.f32.xlu0 %v235_v40 }
 0x162   : > { %v237_v41 = vpop.xlane.xlu0 %236 }
 0x163   : > { %v238_v42 = vsub.f32 %v233_v38, %v237_v41  ;;  %v239_v43 = vsub.f32 %v234_v39, %v237_v41 }
 0x165   : > { %v240_v44 = vmul.f32 1.442695, %v238_v42  ;;  %v242_v45 = vmul.f32 1.442695, %v239_v43 }
 0x167   : > { %383 = vpow2.f32 %v240_v44 }
 0x168   : > { %385 = vpow2.f32 %v242_v45 }
 0x171   : > { %v384_v46 = vpop.eup %383 }
 0x172   : > { %v386_v47 = vpop.eup %385 }
 0x173   : > { %v244_v48 = vadd.f32 %v386_v47, %v384_v46  ;;  %v249_v49 = vcombine.low %v384_v46, %v386_v47 }
 0x175   : > { %245 = vadd.xlane.f32.xlu1 %v244_v48  ;;  %v251_v50 = vmul.f32 %v249_v49, %v188_v9 }
 0x177   : > { %v253_v51 = vcombine.high %v251_v50, %v251_v50  ;;  %v255_v52 = vsel %vm206_vm0, %v251_v50, 0.0 }
 0x179   : > { %v256_v53 = vsel %vm206_vm0, %v253_v51, 0.0 }
 0x17a   : > { %v257_v54 = vadd.f32 %v256_v53, %v255_v52 }
 0x17c   : > { %258 = vadd.xlane.f32.xlu1 %v257_v54 }
 0x202   : > { %v246_v55 = vpop.xlane.xlu1 %245 }
 0x203   : > { %387 = vrcp.f32 %v246_v55 }
 0x209   : > { %v259_v57 = vpop.xlane.xlu1 %258 }
 0x20d   : > { %v388_v56 = vpop.eup %387 }
 0x20e   : > { %v261_v58 = vmul.f32 %v388_v56, %v259_v57 }
 0x210   : > { %263 = vst.msk [vmem:[%s187_s30] sm:$0xf] %vm262_vm1, %v261_v58 }
 0x211 PF: > { %p14_p8 = scmp.ge.s32.totalorder %s503_s18, 4   ;;  %s603_s14 = smov %s445_s15 }
 0x212   : > { %s604_s15 = smov %s449_s16  ;;  %s605_s16 = smov %s513_s21 }
 0x213   : > { %s606_s17 = smov %s503_s18  ;;  %16 = sbr.rel (!%p14_p8) target bundleno = 5 (0x5), region = 72 }
 0x21a   :  { %283 = vsyncpa [#allocation4], 1 }
 0x21b   :  { %285 = vsyncpa [#allocation4 + $0x1], 1 }

</bundles_post_ra>
